<compile_context>
chip_gen: v7x
topology: tpu7x:2x2x1
jax: 0.10.0
libtpu: 0.0.40
codegen_flags: <defaults>
</compile_context>

<pallas_src>
import numpy as np
import jax
import jax.numpy as jnp
from jax.experimental import pallas as pl
from jax.experimental.pallas import tpu as pltpu

_LANE = 128


# ----------------------------------------------------------------------------
# deterministic "module __init__" helpers (parameter construction)
# ----------------------------------------------------------------------------
def moving_avg_matrix(seq_len, kernel_size=25):
    """(L,L) linear operator == moving_avg(kernel_size, stride=1) with edge replication."""
    half = (kernel_size - 1) // 2
    ma = np.zeros((seq_len, seq_len), np.float32)
    for i in range(seq_len):
        for k in range(kernel_size):
            j = min(max(i + k - half, 0), seq_len - 1)
            ma[i, j] += 1.0 / kernel_size
    return ma


def loess_matrix(seq_len, span=0.5):
    """(L,L) row-normalized gaussian weights == loess_smoothing(time, ., span)."""
    t = np.arange(seq_len, dtype=np.float32)
    d = np.abs(t[:, None] - t[None, :])
    w = np.exp(-0.5 * (d / span) ** 2)
    return (w / w.sum(axis=1, keepdims=True)).astype(np.float32)


def init_params(key, cfg, seq_len):
    patch_num = (seq_len - cfg["patch_size"]) // cfg["stride"] + 1 + 1
    feat_dim = cfg["d_model"] * (patch_num + cfg["prompt_token"])
    k1, k2, k3, k4, k5 = jax.random.split(key, 5)
    kin = 1.0 / np.sqrt(cfg["patch_size"])
    kout = 1.0 / np.sqrt(feat_dim)
    return {
        "ma_t": jnp.asarray(moving_avg_matrix(seq_len).T),        # (L, L)
        "w_t": jnp.asarray(loess_matrix(seq_len).T),              # (L, L)
        "w_in": jax.random.uniform(k1, (cfg["patch_size"], cfg["d_model"]),
                                   jnp.float32, -kin, kin),
        "b_in": jax.random.uniform(k2, (1, cfg["d_model"]), jnp.float32, -kin, kin),
        "w_out": jax.random.uniform(k3, (feat_dim, cfg["pred_len"]),
                                    jnp.float32, -kout, kout),
        "b_out": jax.random.uniform(k4, (1, cfg["pred_len"]), jnp.float32, -kout, kout),
        "prompt": jax.random.uniform(k5, (3, cfg["prompt_token"], cfg["d_model"]),
                                     jnp.float32, -0.02, 0.02),
    }


# ----------------------------------------------------------------------------
# init-time operator folding (done ONCE, outside the forward pass)
# ----------------------------------------------------------------------------
def fold_operators(params, cfg, seq_len):
    L = seq_len
    ps, stride = cfg["patch_size"], cfg["stride"]
    dm, token = cfg["d_model"], cfg["prompt_token"]
    P = cfg["pred_len"]
    num = (L + stride - ps) // stride + 1          # == patch_num + 1 in the torch module

    # (1) combined series_decomp(25) + loess:  comp_c = x @ Dec_c ,  A + S + R == I
    ma = moving_avg_matrix(L)
    w = loess_matrix(L)
    A = ma.T.astype(np.float32)                                        # trend operator
    S = ((np.eye(L, dtype=np.float32) - A) @ w.T).astype(np.float32)   # season operator
    R = (np.eye(L, dtype=np.float32) - A - S).astype(np.float32)       # residual operator
    dec_op = np.concatenate([A, S, R], axis=1)                         # (L, 3L)

    # (2) ReplicationPad1d((0,stride)) + unfold(ps,stride) + in_layer Linear
    Pmat = np.zeros((L, L + stride), np.float32)   # pad operator (replicate last step)
    Pmat[np.arange(L), np.arange(L)] = 1.0
    Pmat[L - 1, L:] = 1.0
    w_in = np.asarray(params["w_in"])
    Wbig = np.zeros((L + stride, num * dm), np.float32)
    for t in range(num):
        Wbig[t * stride:t * stride + ps, t * dm:(t + 1) * dm] = w_in
    w_full = Pmat @ Wbig                                               # (L, num*dm)
    b_emb = np.tile(np.asarray(params["b_in"]), (1, num))              # (1, num*dm)

    # (3) prompt tokens + out_layer bias + embedding bias folded into a per-
    #     component output bias;  in_layer/out_layer folded end-to-end into Wf.
    token_dim = token * dm
    w_out = np.asarray(params["w_out"])
    w_out_prompt = w_out[:token_dim]                                   # (token*dm, P)
    w_out_emb = w_out[token_dim:]                                      # (num*dm,  P)
    prompt_flat = np.asarray(params["prompt"]).reshape(3, token_dim)
    bias3 = (prompt_flat @ w_out_prompt + np.asarray(params["b_out"])
             + b_emb @ w_out_emb)                                      # (3, P)
    Wf = w_full @ w_out_emb                                            # (L, P)

    # (4) single fused operator (transposed: lanes = series) and the small
    #     de-norm/bias correction matrix:
    #     out^T = [Wf^T] x^T + aux @ [std_t; std_s; std_r; Σmean]
    big_T = np.ascontiguousarray(np.concatenate([dec_op, Wf], axis=1).T)   # (3L+P, L)
    aux = np.zeros((P, 4), np.float32)
    aux[:, 0:3] = bias3.T                         # bias_c ⊗ std_c terms
    aux[:, 3] = 1.0 - Wf.sum(axis=0)              # (Σmean_c) ⊗ (1 - colsum(Wf)) term

    return {"big_T": jnp.asarray(big_T), "aux": jnp.asarray(aux),
            "seq_len": L, "pred_len": P}


# ----------------------------------------------------------------------------
# fused Pallas kernel (transposed layout: time on sublanes, series on lanes)
# ----------------------------------------------------------------------------
def _fused_kernel(xt_ref, big_ref, aux_ref, o_ref):
    # xt : (L, cb)       column tile of the series (lane axis = series -> dense loads)
    # big: (3L+P, L)     [dec_op | Wf]^T  pinned in VMEM
    # aux: (P, 4)        cols 0..2 = per-component output bias, col 3 = 1 - colsum(Wf)
    # o  : (P, cb)       lane-dense output tile
    L = xt_ref.shape[0]
    P = o_ref.shape[0]
    xt = xt_ref[...]
    allt = jnp.dot(big_ref[...], xt, preferred_element_type=jnp.float32)  # (3L+P, cb)

    # TODO(synk): GPT2Model backbone (configs.is_gpt=True) would run on the
    #             prompt+patch token sequence here; this kernel (and the
    #             end-to-end linear fold) is the is_gpt=False path only.
    stats = []
    mean_sum = None
    for c in range(3):                      # trend / season / res (unrolled at trace time)
        comp = allt[c * L:(c + 1) * L, :]
        mean = jnp.mean(comp, axis=0, keepdims=True)          # (1, cb)
        yc = comp - mean
        var = jnp.mean(yc * yc, axis=0, keepdims=True) + 1e-5  # biased, unbiased=False
        stats.append(jnp.sqrt(var))                            # std_c  (EUP)
        mean_sum = mean if mean_sum is None else mean_sum + mean
    stats.append(mean_sum)
    stats = jnp.concatenate(stats, axis=0)                     # (4, cb)

    # out^T = x^T @ Wf  +  aux @ [std_t; std_s; std_r; Σmean]
    o_ref[...] = allt[3 * L:3 * L + P, :] + jnp.dot(
        aux_ref[...], stats, preferred_element_type=jnp.float32)


# ----------------------------------------------------------------------------
# column-block (lane tile) selection: VMEM-budgeted, multiple of 128,
# >= 2 grid steps for non-trivial n (megacore on v7x, pipelining elsewhere).
# ----------------------------------------------------------------------------
def _round_up(x, m):
    return (x + m - 1) // m * m


def _choose_col_block(n, per_col_bytes, vmem_budget=16 << 20, max_cb=8192):
    n128 = _round_up(max(n, 1), _LANE)
    cap = (vmem_budget // max(per_col_bytes, 1)) // _LANE * _LANE
    cap = max(_LANE, min(max_cb, cap))          # fits v7x's 64 MiB VMEM comfortably
    steps = max(1, -(-n128 // cap))
    if steps == 1 and n128 >= 2 * _LANE:
        steps = 2                               # shard across v7x's 2 TensorCores
    if steps == 2 and n128 >= 8 * 512:
        steps = 4                               # better balance once blocks stay >= 512
    cb = _round_up(-(-n128 // steps), _LANE)
    return min(cb, cap)


def fused_gpt4ts(xT, ops):
    L, n = xT.shape
    big_T, aux = ops["big_T"], ops["aux"]
    P = aux.shape[0]

    # per-column VMEM estimate: double-buffered x/out + (3L+P) intermediate + temps
    per_col = 4 * (9 * L + 5 * P)
    cb = _choose_col_block(n, per_col)
    n_pad = _round_up(n, cb)
    if n_pad != n:
        xT = jnp.pad(xT, ((0, 0), (0, n_pad - n)))   # padded series are zeros (no NaNs)
    grid = (n_pad // cb,)

    out = pl.pallas_call(
        _fused_kernel,
        out_shape=jax.ShapeDtypeStruct((P, n_pad), jnp.float32),
        grid=grid,
        in_specs=[
            pl.BlockSpec((L, cb), lambda i: (0, i)),          # lane-dense x tile
            pl.BlockSpec(big_T.shape, lambda i: (0, 0)),      # pinned fused operator
            pl.BlockSpec(aux.shape, lambda i: (0, 0)),        # pinned bias/de-norm matrix
        ],
        out_specs=pl.BlockSpec((P, cb), lambda i: (0, i)),    # lane-dense output tile
        compiler_params=pltpu.CompilerParams(
            dimension_semantics=("parallel",),
            vmem_limit_bytes=32 << 20),
    )(xT, big_T, aux)
    return out[:, :n]


# ----------------------------------------------------------------------------
# forward pass (GPT4TS.forward semantics, configs.is_gpt = False)
# ----------------------------------------------------------------------------
def gpt4ts_forward(x, ops, cfg):
    B, L, M = x.shape
    assert M == 1, "reference forward's prompt concat requires M == 1"
    # time on the sublane axis, (batch*channel) series on the 128-lane axis
    xT = jnp.transpose(x, (1, 0, 2)).reshape(L, B * M).astype(jnp.float32)
    outT = fused_gpt4ts(xT, ops)                                  # (pred_len, B*M)
    return outT.reshape(cfg["pred_len"], B, M).transpose(1, 0, 2)  # (B, pred_len, M)


# ----------------------------------------------------------------------------
# pure-JAX reference (unfolded math, no Pallas) for the correctness check
# ----------------------------------------------------------------------------
def reference_forward(x, params, cfg):
    B, L, M = x.shape
    ps, stride, dm = cfg["patch_size"], cfg["stride"], cfg["d_model"]
    x2d = jnp.transpose(x, (0, 2, 1)).reshape(B * M, L).astype(jnp.float32)
    trend = x2d @ params["ma_t"]
    season = (x2d - trend) @ params["w_t"]
    res = x2d - trend - season
    y = jnp.concatenate([trend, season, res], axis=0)
    mean = y.mean(axis=1, keepdims=True)
    yc = y - mean
    std = jnp.sqrt((yc * yc).mean(axis=1, keepdims=True) + 1e-5)
    xn = yc / std
    xpad = jnp.concatenate([xn, jnp.repeat(xn[:, -1:], stride, axis=1)], axis=1)
    num = (xpad.shape[1] - ps) // stride + 1
    idx = np.arange(num)[:, None] * stride + np.arange(ps)[None, :]
    emb = xpad[:, idx].reshape(-1, ps) @ params["w_in"] + params["b_in"]
    emb = emb.reshape(3 * B * M, num, dm)
    full = jnp.concatenate([jnp.repeat(params["prompt"], B, axis=0), emb], axis=1)
    feats = full.reshape(3 * B * M, -1)
    o = feats @ params["w_out"] + params["b_out"]
    o = o * std + mean
    n = B * M
    o = o[:n] + o[n:2 * n] + o[2 * n:]
    return o.reshape(B, M, cfg["pred_len"]).transpose(0, 2, 1)


# ----------------------------------------------------------------------------
if __name__ == "__main__":
    cfg = dict(seq_len=32, patch_size=8, stride=4, d_model=32,
               pred_len=16, prompt_token=4, is_gpt=False)
    L = cfg["seq_len"]

    key = jax.random.PRNGKey(0)
    kx, kp, kx2 = jax.random.split(key, 3)
    params = init_params(kp, cfg, L)
    ops = fold_operators(params, cfg, L)          # init-time folding (once)

    fwd = jax.jit(lambda xx: gpt4ts_forward(xx, ops, cfg))

    # small shape: single grid step, heavy lane padding
    B, M = 2, 1
    x = jax.random.normal(kx, (B, L, M), jnp.float32)
    out = jax.block_until_ready(fwd(x))
    assert out.shape == (B, cfg["pred_len"], M), out.shape
    ref = jax.block_until_ready(reference_forward(x, params, cfg))
    np.testing.assert_allclose(np.asarray(out), np.asarray(ref), rtol=2e-2, atol=2e-2)

    # ragged batch: exercises column padding + multi-step grid ("parallel" axis)
    B2 = 260
    x2 = jax.random.normal(kx2, (B2, L, 1), jnp.float32)
    out2 = jax.block_until_ready(fwd(x2))
    ref2 = jax.block_until_ready(reference_forward(x2, params, cfg))
    np.testing.assert_allclose(np.asarray(out2), np.asarray(ref2), rtol=2e-2, atol=2e-2)

    print("KERNEL_OK")
</pallas_src>

<mosaic_0001>
module attributes {stable_mosaic.version = 11 : i64} {
  func.func @_fused_kernel(%arg0: i32, %arg1: memref<32x128xf32, #tpu.memory_space<vmem>>, %arg2: memref<112x32xf32, #tpu.memory_space<vmem>>, %arg3: memref<16x4xf32, #tpu.memory_space<vmem>>, %arg4: memref<16x128xf32, #tpu.memory_space<vmem>>) attributes {dimension_semantics = [#tpu.dimension_semantics<parallel>], iteration_bounds = array<i64: 1>, scalar_prefetch = 0 : i64, scratch_operands = 0 : i64, tpu.core_type = #tpu.core_type<tc>, window_params = [{transform_indices = @transform_0, window_bounds = array<i64: 32, 128>}, {pipeline_mode = #tpu.pipeline_mode<synchronous>, transform_indices = @transform_1, window_bounds = array<i64: 112, 32>}, {pipeline_mode = #tpu.pipeline_mode<synchronous>, transform_indices = @transform_2, window_bounds = array<i64: 16, 4>}, {transform_indices = @transform_3, window_bounds = array<i64: 16, 128>}]} {
    %c0 = arith.constant 0 : index
    %c0_0 = arith.constant 0 : index
    %0 = vector.load %arg1[%c0, %c0_0] : memref<32x128xf32, #tpu.memory_space<vmem>>, vector<32x128xf32>
    %c0_1 = arith.constant 0 : index
    %c0_2 = arith.constant 0 : index
    %1 = vector.load %arg2[%c0_1, %c0_2] : memref<112x32xf32, #tpu.memory_space<vmem>>, vector<112x32xf32>
    %cst = arith.constant dense<0.000000e+00> : vector<112x128xf32>
    %2 = tpu.matmul %1, %0, %cst {dimension_numbers = #tpu.dot_dimension_numbers<[1], [0], [0], [1], [0, 0, 1, 1], [], []>} : vector<112x32xf32>, vector<32x128xf32>, vector<112x128xf32> -> vector<112x128xf32>
    %3 = vector.extract_strided_slice %2 {offsets = [0, 0], sizes = [32, 128], strides = [1, 1]} : vector<112x128xf32> to vector<32x128xf32>
    %cst_3 = arith.constant dense<0.000000e+00> : vector<128xf32>
    %4 = vector.multi_reduction <add>, %3, %cst_3 [0] : vector<32x128xf32> to vector<128xf32>
    %5 = vector.shape_cast %4 : vector<128xf32> to vector<1x128xf32>
    %cst_4 = arith.constant 3.200000e+01 : f32
    %6 = vector.broadcast %cst_4 : f32 to vector<1x128xf32>
    %7 = arith.divf %5, %6 : vector<1x128xf32>
    %8 = vector.broadcast %7 : vector<1x128xf32> to vector<32x128xf32>
    %9 = arith.subf %3, %8 : vector<32x128xf32>
    %10 = arith.mulf %9, %9 : vector<32x128xf32>
    %cst_5 = arith.constant dense<0.000000e+00> : vector<128xf32>
    %11 = vector.multi_reduction <add>, %10, %cst_5 [0] : vector<32x128xf32> to vector<128xf32>
    %12 = vector.shape_cast %11 : vector<128xf32> to vector<1x128xf32>
    %cst_6 = arith.constant 3.200000e+01 : f32
    %13 = vector.broadcast %cst_6 : f32 to vector<1x128xf32>
    %14 = arith.divf %12, %13 : vector<1x128xf32>
    %cst_7 = arith.constant 9.99999974E-6 : f32
    %15 = vector.broadcast %cst_7 : f32 to vector<1x128xf32>
    %16 = arith.addf %14, %15 : vector<1x128xf32>
    %17 = math.sqrt %16 : vector<1x128xf32>
    %18 = vector.extract_strided_slice %2 {offsets = [32, 0], sizes = [32, 128], strides = [1, 1]} : vector<112x128xf32> to vector<32x128xf32>
    %cst_8 = arith.constant dense<0.000000e+00> : vector<128xf32>
    %19 = vector.multi_reduction <add>, %18, %cst_8 [0] : vector<32x128xf32> to vector<128xf32>
    %20 = vector.shape_cast %19 : vector<128xf32> to vector<1x128xf32>
    %cst_9 = arith.constant 3.200000e+01 : f32
    %21 = vector.broadcast %cst_9 : f32 to vector<1x128xf32>
    %22 = arith.divf %20, %21 : vector<1x128xf32>
    %23 = vector.broadcast %22 : vector<1x128xf32> to vector<32x128xf32>
    %24 = arith.subf %18, %23 : vector<32x128xf32>
    %25 = arith.mulf %24, %24 : vector<32x128xf32>
    %cst_10 = arith.constant dense<0.000000e+00> : vector<128xf32>
    %26 = vector.multi_reduction <add>, %25, %cst_10 [0] : vector<32x128xf32> to vector<128xf32>
    %27 = vector.shape_cast %26 : vector<128xf32> to vector<1x128xf32>
    %cst_11 = arith.constant 3.200000e+01 : f32
    %28 = vector.broadcast %cst_11 : f32 to vector<1x128xf32>
    %29 = arith.divf %27, %28 : vector<1x128xf32>
    %cst_12 = arith.constant 9.99999974E-6 : f32
    %30 = vector.broadcast %cst_12 : f32 to vector<1x128xf32>
    %31 = arith.addf %29, %30 : vector<1x128xf32>
    %32 = math.sqrt %31 : vector<1x128xf32>
    %33 = arith.addf %7, %22 : vector<1x128xf32>
    %34 = vector.extract_strided_slice %2 {offsets = [64, 0], sizes = [32, 128], strides = [1, 1]} : vector<112x128xf32> to vector<32x128xf32>
    %cst_13 = arith.constant dense<0.000000e+00> : vector<128xf32>
    %35 = vector.multi_reduction <add>, %34, %cst_13 [0] : vector<32x128xf32> to vector<128xf32>
    %36 = vector.shape_cast %35 : vector<128xf32> to vector<1x128xf32>
    %cst_14 = arith.constant 3.200000e+01 : f32
    %37 = vector.broadcast %cst_14 : f32 to vector<1x128xf32>
    %38 = arith.divf %36, %37 : vector<1x128xf32>
    %39 = vector.broadcast %38 : vector<1x128xf32> to vector<32x128xf32>
    %40 = arith.subf %34, %39 : vector<32x128xf32>
    %41 = arith.mulf %40, %40 : vector<32x128xf32>
    %cst_15 = arith.constant dense<0.000000e+00> : vector<128xf32>
    %42 = vector.multi_reduction <add>, %41, %cst_15 [0] : vector<32x128xf32> to vector<128xf32>
    %43 = vector.shape_cast %42 : vector<128xf32> to vector<1x128xf32>
    %cst_16 = arith.constant 3.200000e+01 : f32
    %44 = vector.broadcast %cst_16 : f32 to vector<1x128xf32>
    %45 = arith.divf %43, %44 : vector<1x128xf32>
    %cst_17 = arith.constant 9.99999974E-6 : f32
    %46 = vector.broadcast %cst_17 : f32 to vector<1x128xf32>
    %47 = arith.addf %45, %46 : vector<1x128xf32>
    %48 = math.sqrt %47 : vector<1x128xf32>
    %49 = arith.addf %33, %38 : vector<1x128xf32>
    %50 = tpu.concatenate %17, %32, %48, %49 in 0 : vector<1x128xf32>, vector<1x128xf32>, vector<1x128xf32>, vector<1x128xf32> -> vector<4x128xf32>
    %51 = vector.extract_strided_slice %2 {offsets = [96, 0], sizes = [16, 128], strides = [1, 1]} : vector<112x128xf32> to vector<16x128xf32>
    %c0_18 = arith.constant 0 : index
    %c0_19 = arith.constant 0 : index
    %52 = vector.load %arg3[%c0_18, %c0_19] : memref<16x4xf32, #tpu.memory_space<vmem>>, vector<16x4xf32>
    %cst_20 = arith.constant dense<0.000000e+00> : vector<16x128xf32>
    %53 = tpu.matmul %52, %50, %cst_20 {dimension_numbers = #tpu.dot_dimension_numbers<[1], [0], [0], [1], [0, 0, 1, 1], [], []>} : vector<16x4xf32>, vector<4x128xf32>, vector<16x128xf32> -> vector<16x128xf32>
    %54 = arith.addf %51, %53 : vector<16x128xf32>
    %c0_21 = arith.constant 0 : index
    %c0_22 = arith.constant 0 : index
    %55 = vector.load %arg4[%c0_21, %c0_22] : memref<16x128xf32, #tpu.memory_space<vmem>>, vector<16x128xf32>
    tpu.vector_store %arg4[%c0_21, %c0_22], %54 {strides = array<i32>} : memref<16x128xf32, #tpu.memory_space<vmem>>, vector<16x128xf32>,
    return
  }
  func.func @transform_0(%arg0: i32) -> (i32, i32) {
    %c0_i32 = arith.constant 0 : i32
    %c0_i32_0 = arith.constant 0 : i32
    return %c0_i32, %arg0 : i32, i32
  }
  func.func @transform_1(%arg0: i32) -> (i32, i32) {
    %c0_i32 = arith.constant 0 : i32
    %c0_i32_0 = arith.constant 0 : i32
    %c0_i32_1 = arith.constant 0 : i32
    return %c0_i32, %c0_i32_0 : i32, i32
  }
  func.func @transform_2(%arg0: i32) -> (i32, i32) {
    %c0_i32 = arith.constant 0 : i32
    %c0_i32_0 = arith.constant 0 : i32
    %c0_i32_1 = arith.constant 0 : i32
    return %c0_i32, %c0_i32_0 : i32, i32
  }
  func.func @transform_3(%arg0: i32) -> (i32, i32) {
    %c0_i32 = arith.constant 0 : i32
    %c0_i32_0 = arith.constant 0 : i32
    return %c0_i32, %arg0 : i32, i32
  }
}

</mosaic_0001>

<bundles_post_ra>
// kernel: _lambda_.1
= control target key start
LH: loop header
LB: loop body
LE: loop exit
PB: predicated region body
PF: predicated region fallthrough
CT: control target
= control target key end

     0   :  { %8 = vsyncpa [#allocation3], 0  ;;  %s557_s12 = smov [#allocation2]   ;;  %s634_s0 = inlined_call_operand.vmem [shape: f32[32,128], index: 0, kind: input, shape index: {}]   ;;  %s635_s1 = inlined_call_operand.hbm [shape: f32[112,32], index: 1, kind: input, shape index: {}]   ;;  %s636_s2 = inlined_call_operand.vmem [shape: f32[16,4], index: 2, kind: input, shape index: {}]   ;;  %s637_s3 = inlined_call_operand.vmem [shape: f32[16,128], index: 3, kind: output, shape index: {}]  }
   0x1   :  { %s16_s13 = sshll.u32 %s557_s12, 4  ;;  %s533_s16 = scalar_lea.hbm %s635_s1, 1792  ;;  %s17_s13 = int_to_ptr.vmem [resolvable:$true] %s16_s13 }
   0x2   :  { %p534_p0 = scmp.ne.s32.totalorder %s635_s1, %s533_s16  ;;  %p537_p1 = scmp.lt.u32.totalorder %s533_s16, %s635_s1 }
   0x4   :  { %p539_p2 = pnand %p537_p1, %p534_p0 }
   0x6   :  { %542 = shalt.err (!%p539_p2)
}
   0x7   :  { %s543_s21 = scalar_lea.vmem %s17_s13, 1792  ;;  %p548_p4 = scmp.lt.s32.totalorder %s17_s13, %s17_s13 }
   0x8   :  { %p544_p3 = scmp.ne.s32.totalorder %s17_s13, %s543_s21  ;;  %p549_p5 = scmp.lt.s32.totalorder %s543_s21, %s543_s21 }
   0xa   :  { %p550_p6 = por %p549_p5, %p548_p4 }
   0xc   :  { %p551_p7 = pnand %p550_p6, %p544_p3 }
   0xe   :  { %554 = shalt.err (!%p551_p7)
}
   0xf   :  { %s558_s22 = smov 128   ;;  %s559_s23 = smov 8  }
  0x10   :  { %22 = dma.hbm_to_vmem [thread:$0]  %s635_s1, 1792, %s17_s13, [#allocation3], %s558_s22, %s558_s22, %s559_s23  }
  0x11   :  { %555 = dma.done.wait [#allocation3], 1792  }
  0x12   :  { %556 = vsyncadd [#allocation3], 4294965504  ;;  %vm46_vm0 = vcmask 261120   ;;  %v28_v0 = vld [vmem:[%s634_s0] sm:$0xff]  ;;  %v29_v1 = vld [vmem:[%s634_s0 + $0x8] sm:$0xff]  ;;  %vm343_vm1 = vcmask 31744  }
  0x13   :  { %v30_v2 = vld [vmem:[%s634_s0 + $0x10] sm:$0xff]  ;;  %v510_v3 = vpack.c.bf16 %v29_v1, %v28_v0  ;;  %v31_v4 = vld [vmem:[%s634_s0 + $0x18] sm:$0xff]  ;;  %v32_v5 = vld [vmem:[#allocation2] sm:$0xff]  ;;  %vm335_vm3 = vcmask 1040384   ;;  %vm337_vm5 = vcmask 1041408   ;;  %vm339_vm10 = vcmask 1042432  }
  0x14   :  { %v38_v6 = vld [vmem:[#allocation2 + $0x30] sm:$0xff]  ;;  %v514_v7 = vpack.c.bf16 %v31_v4, %v30_v2  ;;  %484 = vmatprep.mubr.msk.f32.mxu0 %vm46_vm0, %v32_v5  ;;  %v33_v8 = vld [vmem:[#allocation2 + $0x8] sm:$0xff]  ;;  %v39_v9 = vld [vmem:[#allocation2 + $0x38] sm:$0xff]  ;;  %vm350_vm11 = vcmask 1043456  }
  0x15   :  { %493 = vmatprep.mubr.msk.f32.mxu1 %vm46_vm0, %v38_v6  ;;  %511 = vmatprep.subr.bf16.mxu0 %v510_v3  ;;  %v34_v10 = vld [vmem:[#allocation2 + $0x10] sm:$0xff]  ;;  %v40_v11 = vld [vmem:[#allocation2 + $0x40] sm:$0xff]  ;;  %v35_v12 = vld [vmem:[#allocation2 + $0x18] sm:$0xff] }
  0x16   :  { %518 = vmatprep.subr.bf16.mxu1 %v510_v3  ;;  %513 = vmatpush3.bf16.msra.mxu0 %v510_v3  ;;  %v41_v13 = vld [vmem:[#allocation2 + $0x48] sm:$0xff]  ;;  %v36_v14 = vld [vmem:[#allocation2 + $0x20] sm:$0xff]  ;;  %v42_v15 = vld [vmem:[#allocation2 + $0x50] sm:$0xff] }
  0x17   :  { %520 = vmatpush3.bf16.msra.mxu1 %v510_v3  ;;  %515 = vmatprep.subr.bf16.mxu0 %v514_v7  ;;  %v37_v16 = vld [vmem:[#allocation2 + $0x28] sm:$0xff]  ;;  %v43_v17 = vld [vmem:[#allocation2 + $0x58] sm:$0xff]  ;;  %v44_v18 = vld [vmem:[#allocation2 + $0x60] sm:$0xff] }
  0x18   :  { %519 = vmatprep.subr.bf16.mxu1 %v514_v7  ;;  %v341_v19 = vld [vmem:[%s636_s2] sm:$0xff]  ;;  %v45_v20 = vld [vmem:[#allocation2 + $0x68] sm:$0xff] }
  0x1a   :  { %517 = vmatpush3.bf16.msra.mxu0 %v514_v7 }
  0x1b   :  { %521 = vmatpush3.bf16.msra.mxu1 %v514_v7 }
  0x1d   :  { %485 = vmatmul.mubr.msk.f32.vlgmr.msra.gmra.mrb[0].mxu0 %vm46_vm0, %v33_v8 }
  0x1e   :  { %494 = vmatmul.mubr.msk.f32.vlgmr.msra.gmra.mrb[0].mxu1 %vm46_vm0, %v39_v9  ;;  %487 = vmatprep.mubr.msk.f32.mxu0 %vm46_vm0, %v34_v10 }
  0x1f   :  { %496 = vmatprep.mubr.msk.f32.mxu1 %vm46_vm0, %v40_v11 }
  0x21   :  { %488 = vmatmul.mubr.msk.f32.gmra.mrb[2].mxu0 %vm46_vm0, %v35_v12 }
  0x22   :  { %497 = vmatmul.mubr.msk.f32.gmra.mrb[2].mxu1 %vm46_vm0, %v41_v13  ;;  %490 = vmatprep.mubr.msk.f32.mxu0 %vm46_vm0, %v36_v14 }
  0x23   :  { %499 = vmatprep.mubr.msk.f32.mxu1 %vm46_vm0, %v42_v15 }
  0x25   :  { %491 = vmatmul.mubr.msk.f32.gmra.mrb[4].mxu0 %vm46_vm0, %v37_v16 }
  0x26   :  { %500 = vmatmul.mubr.msk.f32.gmra.mrb[4].mxu1 %vm46_vm0, %v43_v17  ;;  %507 = vmatprep.mubr.msk.f32.mxu0 %vm343_vm1, %v341_v19 }
  0x27   :  { %502 = vmatprep.mubr.msk.f32.mxu1 %vm46_vm0, %v44_v18 }
  0x2a   :  { %503 = vmatmul.mubr.msk.f32.gmra.mrb[6].mxu1 %vm46_vm0, %v45_v20 }
  0xf0   :  { %v486_v21 = vpop.f32.mrb[0].mxu0 }
  0xf1   :  { %v495_v22 = vpop.f32.mrb[0].mxu1  ;;  %v155_v23 = vpop.f32.mrb[1].mxu0 }
  0xf2   :  { %v185_v24 = vpop.f32.mrb[1].mxu1  ;;  %v224_v25 = vadd.f32 %v486_v21, %v155_v23 }
  0xf4   :  { %v489_v26 = vpop.f32.mrb[2].mxu0 }
  0xf5   :  { %v498_v27 = vpop.f32.mrb[2].mxu1  ;;  %v165_v28 = vpop.f32.mrb[3].mxu0 }
  0xf6   :  { %v195_v29 = vpop.f32.mrb[3].mxu1  ;;  %v225_v30 = vadd.f32 %v224_v25, %v165_v28 }
  0xf7   :  { %v298_v31 = vadd.f32 %v498_v27, %v195_v29 }
  0xf8   :  { %v226_v32 = vadd.f32 %v489_v26, %v225_v30  ;;  %v492_v33 = vpop.f32.mrb[4].mxu0 }
  0xf9   :  { %v501_v34 = vpop.f32.mrb[4].mxu1  ;;  %v175_v35 = vpop.f32.mrb[5].mxu0 }
  0xfa   :  { %v205_v36 = vpop.f32.mrb[5].mxu1  ;;  %v227_v37 = vrot.slane %v226_v32, 4  ;;  %v261_v38 = vadd.f32 %v492_v33, %v175_v35 }
  0xfb   :  { %v299_v39 = vadd.f32 %v298_v31, %v205_v36 }
  0xfc   :  { %v228_v40 = vadd.f32 %v227_v37, %v226_v32  ;;  %v262_v41 = vadd.f32 %v261_v38, %v185_v24 }
  0xfd   :  { %v300_v42 = vadd.f32 %v501_v34, %v299_v39 }
  0xfe   :  { %v229_v43 = vrot.slane %v228_v40, 2  ;;  %v263_v44 = vadd.f32 %v495_v22, %v262_v41 }
  0xff   :  { %v301_v45 = vrot.slane %v300_v42, 4 }
 0x100   :  { %v230_v46 = vadd.f32 %v229_v43, %v228_v40  ;;  %v264_v47 = vrot.slane %v263_v44, 4 }
 0x101   :  { %v302_v48 = vadd.f32 %v301_v45, %v300_v42 }
 0x102   :  { %v231_v49 = vrot.slane %v230_v46, 1  ;;  %v265_v50 = vadd.f32 %v264_v47, %v263_v44 }
 0x103   :  { %v303_v51 = vrot.slane %v302_v48, 2 }
 0x104   :  { %v232_v52 = vadd.f32 %v231_v49, %v230_v46  ;;  %v266_v53 = vrot.slane %v265_v50, 2 }
 0x105   :  { %v304_v54 = vadd.f32 %v303_v51, %v302_v48 }
 0x106   :  { %v234_v55 = vmul.f32 0.03125, %v232_v52  ;;  %v267_v56 = vadd.f32 %v266_v53, %v265_v50 }
 0x107   :  { %v305_v57 = vrot.slane %v304_v54, 1 }
 0x108   :  { %v235_v58 = vsub.f32 %v155_v23, %v234_v55  ;;  %v236_v59 = vsub.f32 %v486_v21, %v234_v55  ;;  %v237_v60 = vsub.f32 %v165_v28, %v234_v55  ;;  %v238_v61 = vsub.f32 %v489_v26, %v234_v55 }
 0x109   :  { %v268_v62 = vrot.slane %v267_v56, 1  ;;  %v306_v63 = vadd.f32 %v305_v57, %v304_v54 }
 0x10a   :  { %v239_v0 = vmul.f32 %v235_v58, %v235_v58  ;;  %v240_v1 = vmul.f32 %v236_v59, %v236_v59  ;;  %v241_v4 = vmul.f32 %v237_v60, %v237_v60  ;;  %v242_v10 = vmul.f32 %v238_v61, %v238_v61 }
 0x10b   :  { %v269_v2 = vadd.f32 %v268_v62, %v267_v56  ;;  %v307_v3 = vmul.f32 0.03125, %v306_v63 }
 0x10c   :  { %v243_v5 = vadd.f32 %v240_v1, %v239_v0 }
 0x10d   :  { %v270_v6 = vmul.f32 0.03125, %v269_v2  ;;  %v308_v7 = vsub.f32 %v195_v29, %v307_v3  ;;  %v309_v8 = vsub.f32 %v498_v27, %v307_v3  ;;  %v310_v9 = vsub.f32 %v205_v36, %v307_v3 }
 0x10e   :  { %v244_v11 = vadd.f32 %v243_v5, %v241_v4  ;;  %v311_v12 = vsub.f32 %v501_v34, %v307_v3 }
 0x10f   :  { %v271_v13 = vsub.f32 %v175_v35, %v270_v6  ;;  %v272_v14 = vsub.f32 %v492_v33, %v270_v6  ;;  %v273_v15 = vsub.f32 %v185_v24, %v270_v6  ;;  %v274_v16 = vsub.f32 %v495_v22, %v270_v6 }
 0x110   :  { %v245_v17 = vadd.f32 %v244_v11, %v242_v10  ;;  %v312_v18 = vmul.f32 %v308_v7, %v308_v7  ;;  %v313_v19 = vmul.f32 %v309_v8, %v309_v8  ;;  %v314_v25 = vmul.f32 %v310_v9, %v310_v9 }
 0x111   :  { %v275_v20 = vmul.f32 %v271_v13, %v271_v13  ;;  %v276_v21 = vmul.f32 %v272_v14, %v272_v14  ;;  %v297_v28 = vadd.f32 %v270_v6, %v234_v55  ;;  %v277_v30 = vmul.f32 %v273_v15, %v273_v15  ;;  %v504_v13 = vpop.f32.mrb[6].mxu1 }
 0x112   :  { %v246_v23 = vrot.slane %v245_v17, 4  ;;  %v316_v26 = vadd.f32 %v313_v19, %v312_v18  ;;  %v315_v31 = vmul.f32 %v311_v12, %v311_v12  ;;  %v278_v34 = vmul.f32 %v274_v16, %v274_v16  ;;  %v342_v12 = vld [vmem:[%s636_s2 + $0x8] sm:$0xff]  ;;  %v215_v14 = vpop.f32.mrb[7].mxu1 }
 0x113   :  { %v279_v29 = vadd.f32 %v276_v21, %v275_v20  ;;  %v334_v36 = vadd.f32 %v307_v3, %v297_v28 }
 0x114   :  { %v247_v27 = vadd.f32 %v246_v23, %v245_v17  ;;  %v317_v32 = vadd.f32 %v316_v26, %v314_v25 }
 0x115   :  { %v280_v35 = vadd.f32 %v279_v29, %v277_v30 }
 0x116   :  { %v248_v33 = vrot.slane %v247_v27, 2  ;;  %v318_v24 = vadd.f32 %v317_v32, %v315_v31 }
 0x117   :  { %v281_v22 = vadd.f32 %v280_v35, %v278_v34 }
 0x118   :  { %v249_v37 = vadd.f32 %v248_v33, %v247_v27  ;;  %v319_v38 = vrot.slane %v318_v24, 4 }
 0x119   :  { %v282_v39 = vrot.slane %v281_v22, 4 }
 0x11a   :  { %v250_v40 = vrot.slane %v249_v37, 1  ;;  %v320_v41 = vadd.f32 %v319_v38, %v318_v24 }
 0x11b   :  { %v283_v42 = vadd.f32 %v282_v39, %v281_v22 }
 0x11c   :  { %v251_v43 = vadd.f32 %v250_v40, %v249_v37  ;;  %v321_v44 = vrot.slane %v320_v41, 2 }
 0x11d   :  { %v284_v45 = vrot.slane %v283_v42, 2 }
 0x11e   :  { %v252_v46 = vmul.f32 0.03125, %v251_v43  ;;  %v322_v47 = vadd.f32 %v321_v44, %v320_v41 }
 0x11f   :  { %v285_v48 = vadd.f32 %v284_v45, %v283_v42 }
 0x120   :  { %v253_v49 = vadd.f32 1e-05, %v252_v46  ;;  %v323_v50 = vrot.slane %v322_v47, 1 }
 0x121   :  { %v286_v51 = vrot.slane %v285_v48, 1 }
 0x122   :  { %v324_v52 = vadd.f32 %v323_v50, %v322_v47  ;;  %527 = vrsqrt.f32 %v253_v49  ;;  %vm256_vm2 = vcmp.eq.f32.partialorder %v253_v49, inf  ;;  %v259_v1 = vand.u32 2147483648, %v253_v49 }
 0x123   :  { %v287_v53 = vadd.f32 %v286_v51, %v285_v48  ;;  %vm258_vm7 = vcmp.eq.f32.partialorder %v253_v49, 0.0 }
 0x124   :  { %v325_v54 = vmul.f32 0.03125, %v324_v52 }
 0x125   :  { %v288_v55 = vmul.f32 0.03125, %v287_v53 }
 0x126   :  { %v326_v56 = vadd.f32 1e-05, %v325_v54 }
 0x127   :  { %v289_v57 = vadd.f32 1e-05, %v288_v55 }
 0x128   :  { %529 = vrsqrt.f32 %v326_v56  ;;  %vm329_vm4 = vcmp.eq.f32.partialorder %v326_v56, inf  ;;  %v332_v5 = vand.u32 2147483648, %v326_v56  ;;  %vm331_vm9 = vcmp.eq.f32.partialorder %v326_v56, 0.0 }
 0x129   :  { %531 = vrsqrt.f32 %v289_v57  ;;  %vm292_vm6 = vcmp.eq.f32.partialorder %v289_v57, inf  ;;  %v295_v2 = vand.u32 2147483648, %v289_v57  ;;  %vm294_vm8 = vcmp.eq.f32.partialorder %v289_v57, 0.0 }
 0x12c   :  { %v528_v58 = vpop.eup %527 }
 0x12d   :  { %v255_v59 = vmul.f32 %v528_v58, %v253_v49 }
 0x12f   :  { %v257_v63 = vsel %vm256_vm2, %v253_v49, %v255_v59 }
 0x130   :  { %v260_v6 = vsel %vm258_vm7, %v259_v1, %v257_v63 }
 0x132   :  { %v530_v60 = vpop.eup %529 }
 0x133   :  { %v532_v61 = vpop.eup %531  ;;  %v328_v62 = vmul.f32 %v530_v60, %v326_v56 }
 0x134   :  { %v291_v0 = vmul.f32 %v532_v61, %v289_v57 }
 0x135   :  { %v330_v3 = vsel %vm329_vm4, %v326_v56, %v328_v62 }
 0x136   :  { %v293_v4 = vsel %vm292_vm6, %v289_v57, %v291_v0  ;;  %v333_v8 = vsel %vm331_vm9, %v332_v5, %v330_v3 }
 0x137   :  { %v296_v7 = vsel %vm294_vm8, %v295_v2, %v293_v4 }
 0x138   :  { %v336_v9 = vsel %vm335_vm3, %v260_v6, %v296_v7 }
 0x139   :  { %v338_v10 = vsel %vm337_vm5, %v336_v9, %v333_v8 }
 0x13a   :  { %v340_v11 = vsel %vm339_vm10, %v338_v10, %v334_v36 }
 0x13b   :  { %505 = vmatprep.subr.msk.mxu0 %vm350_vm11, %v340_v11 }
 0x13c   :  { %506 = vmatpush3.msk.msra.mxu0 %vm350_vm11, %v340_v11 }
 0x13d   :  { %508 = vmatmul.mubr.msk.f32.vlgmr.msra.gmra.mrb[6].mxu0 %vm343_vm1, %v342_v12 }
 0x210   :  { %v509_v15 = vpop.f32.mrb[6].mxu0 }
 0x211   :  { %v430_v16 = vadd.f32 %v509_v15, %v504_v13  ;;  %v420_v17 = vpop.f32.mrb[7].mxu0 }
 0x212   :  { %v429_v18 = vadd.f32 %v420_v17, %v215_v14 }
 0x213   :  { %432 = vst [vmem:[%s637_s3 + $0x8] sm:$0xff] %v430_v16 }
 0x214   :  { %431 = vst [vmem:[%s637_s3] sm:$0xff] %v429_v18 }
 0x215   :  { %437 = vsyncpa [#allocation3], 1 }

</bundles_post_ra>
